<compile_context>
chip_gen: v7x
topology: tpu7x:2x2x1
jax: 0.10.0
libtpu: 0.0.40
codegen_flags: <defaults>
</compile_context>

<pallas_src>
import functools

import jax
import jax.numpy as jnp
from jax.experimental import pallas as pl
from jax.experimental.pallas import tpu as pltpu

_LANES = 128
_SUBLANES = 32  # covers f32 (8), bf16 (16) and int8 (32) sublane tiling


def _dice_kernel(pred_ref, tgt_ref, num_ref, den_ref, num_acc, den_acc, *,
                 num_classes):
    # pred_ref: (1, C, TB, 128) logits, native dtype (f32/bf16)
    # tgt_ref:  (1, 1, TB, 128) class indices (int8/int32); padded columns hold
    #           the out-of-range sentinel == num_classes
    # num_ref / den_ref: (1, 1, 1, C) f32, resident across the S axis
    # num_acc / den_acc: (1, C, 128) f32 lane-wide running partial sums
    s_step = pl.program_id(2)

    @pl.when(s_step == 0)
    def _():
        num_acc[...] = jnp.zeros_like(num_acc)
        den_acc[...] = jnp.zeros_like(den_acc)

    p = pred_ref[...].astype(jnp.float32)            # (1, C, TB, 128)
    t = tgt_ref[...].astype(jnp.int32)               # (1, 1, TB, 128)

    # Numerically-stable softmax over the channel axis.  C is a leading
    # (non-vreg) dim, so max/sum are elementwise VALU combines across C planes.
    m = jnp.max(p, axis=1, keepdims=True)            # (1, 1, TB, 128)
    e = jnp.exp(p - m)                               # (1, C, TB, 128)
    d = jnp.sum(e, axis=1, keepdims=True)            # (1, 1, TB, 128)
    r = pl.reciprocal(d, approx=True)                # EUP
    r = r * (2.0 - d * r)                            # one Newton step (~f32)
    sm = e * r                                       # (1, C, TB, 128)

    c_iota = jax.lax.broadcasted_iota(jnp.int32, p.shape, 1)
    onehot = c_iota == t                             # (1, C, TB, 128) bool
    valid = t < num_classes                          # (1, 1, TB, 128) bool

    # num: softmax where the class matches.
    # den: softmax^2 (masked off on padded columns) + one-hot count
    #      (onehot^2 == onehot), fused into a single reduce.
    sq = sm * sm
    num_c = jnp.where(onehot, sm, 0.0)
    den_c = jnp.where(valid, sq, 0.0) + onehot.astype(jnp.float32)

    # Per-lane partial sums (sublane reduce only); the 128-lane reduce is
    # deferred to the finalize step below.
    num_acc[...] += jnp.sum(num_c, axis=2)           # (1, C, 128)
    den_acc[...] += jnp.sum(den_c, axis=2)

    @pl.when(s_step == pl.num_programs(2) - 1)
    def _():
        num_ref[0, 0] = jnp.sum(num_acc[...], axis=2)   # (1, C)
        den_ref[0, 0] = jnp.sum(den_acc[...], axis=2)


def _pick_row_tile(rows, row_bytes, budget_bytes):
    """Largest multiple of 32 rows dividing `rows` whose double-buffered input
    footprint stays under `budget_bytes`."""
    cap = max(_SUBLANES,
              (budget_bytes // (2 * row_bytes)) // _SUBLANES * _SUBLANES)
    for cand in range(min(cap, rows), _SUBLANES - 1, -_SUBLANES):
        if rows % cand == 0:
            return cand
    return _SUBLANES


def dice_loss(predict_nchw, target_nhw, smooth=1.0):
    """DiceLoss.forward with default kwargs (smooth=1, p=2, reduction='mean',
    weight=None, ignore_index=None)."""
    N, C, H, W = predict_nchw.shape
    S = H * W

    if not jnp.issubdtype(predict_nchw.dtype, jnp.floating):
        predict_nchw = predict_nchw.astype(jnp.float32)
    pred_dtype = predict_nchw.dtype

    # Narrow label dtype in HBM (the padding sentinel C must fit).
    tgt_dtype = jnp.int8 if C <= 127 else jnp.int32

    # v7x has 2 TensorCores: when N alone cannot fill/balance them, split the
    # spatial axis into G=2 independent parallel groups (no-op on v5e/v6e).
    G = 2 if (N % 2 == 1) else 1

    # Pad S so each parallel group is a whole number of (32, 128) tiles.
    chunk = G * _SUBLANES * _LANES
    S_pad = -(-S // chunk) * chunk
    R = S_pad // _LANES          # 128-lane rows, multiple of G * 32
    Rg = R // G                  # rows per parallel spatial group

    pred = predict_nchw.reshape(N, C, S)
    tgt = target_nhw.reshape(N, 1, S).astype(tgt_dtype)
    if S_pad != S:
        pad = S_pad - S
        pred = jnp.pad(pred, ((0, 0), (0, 0), (0, pad)))
        # Padded pixels get the out-of-range class C; the kernel masks them out.
        tgt = jnp.pad(tgt, ((0, 0), (0, 0), (0, pad)), constant_values=C)
    pred = pred.reshape(N, C, R, _LANES)
    tgt = tgt.reshape(N, 1, R, _LANES)

    # VMEM-aware spatial tile: ~12 MiB of double-buffered inputs per step,
    # well under the 32 MiB scoped limit requested below (safe on v5e/v6e/v7x).
    pred_bytes = jnp.dtype(pred_dtype).itemsize
    tgt_bytes = jnp.dtype(tgt_dtype).itemsize
    row_bytes = _LANES * (C * pred_bytes + tgt_bytes)
    TB = _pick_row_tile(Rg, row_bytes, budget_bytes=12 * 1024 * 1024)
    n_s = Rg // TB

    cost = pl.CostEstimate(
        flops=12 * N * C * S_pad,
        transcendentals=N * C * S_pad,
        bytes_accessed=N * S_pad * (C * pred_bytes + tgt_bytes) + 8 * N * G * C,
    )

    num_out, den_out = pl.pallas_call(
        functools.partial(_dice_kernel, num_classes=C),
        out_shape=(jax.ShapeDtypeStruct((N, G, 1, C), jnp.float32),
                   jax.ShapeDtypeStruct((N, G, 1, C), jnp.float32)),
        grid_spec=pltpu.PrefetchScalarGridSpec(
            num_scalar_prefetch=0,
            grid=(N, G, n_s),
            in_specs=[
                pl.BlockSpec((1, C, TB, _LANES),
                             lambda n, g, s: (n, 0, g * n_s + s, 0)),
                pl.BlockSpec((1, 1, TB, _LANES),
                             lambda n, g, s: (n, 0, g * n_s + s, 0)),
            ],
            # Same block index across the S axis => resident accumulator outputs.
            out_specs=[
                pl.BlockSpec((1, 1, 1, C), lambda n, g, s: (n, g, 0, 0)),
                pl.BlockSpec((1, 1, 1, C), lambda n, g, s: (n, g, 0, 0)),
            ],
            scratch_shapes=[
                pltpu.VMEM((1, C, _LANES), jnp.float32),  # dice numerator partials
                pltpu.VMEM((1, C, _LANES), jnp.float32),  # dice denominator partials
            ],
        ),
        compiler_params=pltpu.CompilerParams(
            dimension_semantics=("parallel", "parallel", "arbitrary"),
            vmem_limit_bytes=32 * 1024 * 1024,
        ),
        cost_estimate=cost,
    )(pred, tgt)

    # Tiny exact epilogue in plain JAX: combine spatial groups, per-class binary
    # dice, mean over batch, sum over classes, divide by #classes.
    num = jnp.sum(num_out, axis=(1, 2))   # (N, C)
    den = jnp.sum(den_out, axis=(1, 2))   # (N, C)
    loss_nc = 1.0 - (num + smooth) / (den + smooth)
    return jnp.sum(jnp.mean(loss_nc, axis=0)) / C


def _dice_loss_ref(predict_nchw, target_nhw, smooth=1.0):
    """Pure-JAX reference mirroring the PyTorch module."""
    N, C, H, W = predict_nchw.shape
    sm = jax.nn.softmax(predict_nchw.astype(jnp.float32), axis=1)
    onehot = jax.nn.one_hot(target_nhw, C, axis=1, dtype=jnp.float32)
    p = sm.reshape(N, C, -1)
    t = onehot.reshape(N, C, -1)
    num = jnp.sum(p * t, axis=2) + smooth
    den = jnp.sum(p ** 2 + t ** 2, axis=2) + smooth
    loss_nc = 1.0 - num / den            # (N, C)
    return jnp.sum(jnp.mean(loss_nc, axis=0)) / C


if __name__ == "__main__":
    key = jax.random.PRNGKey(0)
    k_pred, k_tgt = jax.random.split(key)

    N, C, H, W = 2, 4, 16, 16
    predict = jax.random.normal(k_pred, (N, C, H, W), dtype=jnp.float32)
    target = jax.random.randint(k_tgt, (N, H, W), 0, C, dtype=jnp.int32)

    out = jax.block_until_ready(dice_loss(predict, target))
    ref = jax.block_until_ready(_dice_loss_ref(predict, target))

    # Loose-ish tolerance: the softmax denominator uses the EUP approximate
    # reciprocal plus one Newton step instead of an exact divide.
    assert jnp.allclose(out, ref, atol=1e-4, rtol=1e-4), (out, ref)

    print("KERNEL_OK")
</pallas_src>

<mosaic_0001>
module attributes {stable_mosaic.version = 11 : i64} {
  func.func @_dice_kernel(%arg0: i32, %arg1: i32, %arg2: i32, %arg3: memref<1x4x32x128xf32, #tpu.memory_space<vmem>>, %arg4: memref<1x1x32x128xi8, #tpu.memory_space<vmem>>, %arg5: memref<1x1x1x4xf32, #tpu.memory_space<vmem>>, %arg6: memref<1x1x1x4xf32, #tpu.memory_space<vmem>>, %arg7: memref<1x4x128xf32, #tpu.memory_space<vmem>>, %arg8: memref<1x4x128xf32, #tpu.memory_space<vmem>>) attributes {dimension_semantics = [#tpu.dimension_semantics<parallel>, #tpu.dimension_semantics<parallel>, #tpu.dimension_semantics<arbitrary>], iteration_bounds = array<i64: 2, 1, 1>, scalar_prefetch = 0 : i64, scratch_operands = 2 : i64, tpu.core_type = #tpu.core_type<tc>, window_params = [{transform_indices = @transform_0, window_bounds = array<i64: 1, 4, 32, 128>}, {transform_indices = @transform_1, window_bounds = array<i64: 1, 1, 32, 128>}, {transform_indices = @transform_2, window_bounds = array<i64: 1, 1, 1, 4>}, {transform_indices = @transform_3, window_bounds = array<i64: 1, 1, 1, 4>}]} {
    %c0_i32 = arith.constant 0 : i32
    %0 = arith.cmpi eq, %arg2, %c0_i32 : i32
    %1 = arith.extui %0 : i1 to i32
    %c0_i32_0 = arith.constant 0 : i32
    %2 = arith.cmpi ne, %1, %c0_i32_0 : i32
    scf.if %2 {
      %cst_28 = arith.constant 0.000000e+00 : f32
      %46 = vector.broadcast %cst_28 : f32 to vector<1x4x128xf32>
      %c0_29 = arith.constant 0 : index
      %c0_30 = arith.constant 0 : index
      %c0_31 = arith.constant 0 : index
      %47 = vector.load %arg7[%c0_29, %c0_30, %c0_31] : memref<1x4x128xf32, #tpu.memory_space<vmem>>, vector<1x4x128xf32>
      tpu.vector_store %arg7[%c0_29, %c0_30, %c0_31], %46 {strides = array<i32>} : memref<1x4x128xf32, #tpu.memory_space<vmem>>, vector<1x4x128xf32>,
      %cst_32 = arith.constant 0.000000e+00 : f32
      %48 = vector.broadcast %cst_32 : f32 to vector<1x4x128xf32>
      %c0_33 = arith.constant 0 : index
      %c0_34 = arith.constant 0 : index
      %c0_35 = arith.constant 0 : index
      %49 = vector.load %arg8[%c0_33, %c0_34, %c0_35] : memref<1x4x128xf32, #tpu.memory_space<vmem>>, vector<1x4x128xf32>
      tpu.vector_store %arg8[%c0_33, %c0_34, %c0_35], %48 {strides = array<i32>} : memref<1x4x128xf32, #tpu.memory_space<vmem>>, vector<1x4x128xf32>,
    } else {
    }
    %c0 = arith.constant 0 : index
    %c0_1 = arith.constant 0 : index
    %c0_2 = arith.constant 0 : index
    %c0_3 = arith.constant 0 : index
    %3 = vector.load %arg3[%c0, %c0_1, %c0_2, %c0_3] : memref<1x4x32x128xf32, #tpu.memory_space<vmem>>, vector<1x4x32x128xf32>
    %c0_4 = arith.constant 0 : index
    %c0_5 = arith.constant 0 : index
    %c0_6 = arith.constant 0 : index
    %c0_7 = arith.constant 0 : index
    %4 = vector.load %arg4[%c0_4, %c0_5, %c0_6, %c0_7] : memref<1x1x32x128xi8, #tpu.memory_space<vmem>>, vector<1x1x32x128xi8>
    %5 = arith.extsi %4 : vector<1x1x32x128xi8> to vector<1x1x32x128xi32>
    %cst = arith.constant dense<0xFF800000> : vector<1x32x128xf32>
    %6 = vector.multi_reduction <maximumf>, %3, %cst [1] : vector<1x4x32x128xf32> to vector<1x32x128xf32>
    %7 = vector.shape_cast %6 : vector<1x32x128xf32> to vector<1x1x32x128xf32>
    %8 = vector.broadcast %7 : vector<1x1x32x128xf32> to vector<1x4x32x128xf32>
    %9 = arith.subf %3, %8 : vector<1x4x32x128xf32>
    %10 = math.exp %9 : vector<1x4x32x128xf32>
    %cst_8 = arith.constant dense<0.000000e+00> : vector<1x32x128xf32>
    %11 = vector.multi_reduction <add>, %10, %cst_8 [1] : vector<1x4x32x128xf32> to vector<1x32x128xf32>
    %12 = vector.shape_cast %11 : vector<1x32x128xf32> to vector<1x1x32x128xf32>
    %13 = tpu.reciprocal %12 {approx = true} : vector<1x1x32x128xf32> -> vector<1x1x32x128xf32>
    %14 = arith.mulf %12, %13 : vector<1x1x32x128xf32>
    %cst_9 = arith.constant 2.000000e+00 : f32
    %15 = vector.broadcast %cst_9 : f32 to vector<1x1x32x128xf32>
    %16 = arith.subf %15, %14 : vector<1x1x32x128xf32>
    %17 = arith.mulf %13, %16 : vector<1x1x32x128xf32>
    %18 = vector.broadcast %17 : vector<1x1x32x128xf32> to vector<1x4x32x128xf32>
    %19 = arith.mulf %10, %18 : vector<1x4x32x128xf32>
    %20 = tpu.iota {dimensions = array<i32: 1>} : vector<1x4x32x128xi32>
    %21 = vector.broadcast %5 : vector<1x1x32x128xi32> to vector<1x4x32x128xi32>
    %22 = arith.cmpi eq, %20, %21 : vector<1x4x32x128xi32>
    %c4_i32 = arith.constant 4 : i32
    %23 = vector.broadcast %c4_i32 : i32 to vector<1x1x32x128xi32>
    %24 = arith.cmpi slt, %5, %23 : vector<1x1x32x128xi32>
    %25 = arith.mulf %19, %19 : vector<1x4x32x128xf32>
    %cst_10 = arith.constant 0.000000e+00 : f32
    %26 = vector.broadcast %cst_10 : f32 to vector<1x4x32x128xf32>
    %27 = arith.select %22, %19, %26 : vector<1x4x32x128xi1>, vector<1x4x32x128xf32>
    %cst_11 = arith.constant 0.000000e+00 : f32
    %28 = vector.shape_cast %24 : vector<1x1x32x128xi1> to vector<1x1x32x128xi1>
    %29 = vector.broadcast %28 : vector<1x1x32x128xi1> to vector<1x4x32x128xi1>
    %30 = vector.broadcast %cst_11 : f32 to vector<1x4x32x128xf32>
    %31 = arith.select %29, %25, %30 : vector<1x4x32x128xi1>, vector<1x4x32x128xf32>
    %32 = arith.extui %22 : vector<1x4x32x128xi1> to vector<1x4x32x128xi32>
    %33 = arith.sitofp %32 : vector<1x4x32x128xi32> to vector<1x4x32x128xf32>
    %34 = arith.addf %31, %33 : vector<1x4x32x128xf32>
    %c0_12 = arith.constant 0 : index
    %c0_13 = arith.constant 0 : index
    %c0_14 = arith.constant 0 : index
    %35 = vector.load %arg7[%c0_12, %c0_13, %c0_14] : memref<1x4x128xf32, #tpu.memory_space<vmem>>, vector<1x4x128xf32>
    %cst_15 = arith.constant dense<0.000000e+00> : vector<1x4x128xf32>
    %36 = vector.multi_reduction <add>, %27, %cst_15 [2] : vector<1x4x32x128xf32> to vector<1x4x128xf32>
    %37 = arith.addf %35, %36 : vector<1x4x128xf32>
    %c0_16 = arith.constant 0 : index
    %c0_17 = arith.constant 0 : index
    %c0_18 = arith.constant 0 : index
    %38 = vector.load %arg7[%c0_16, %c0_17, %c0_18] : memref<1x4x128xf32, #tpu.memory_space<vmem>>, vector<1x4x128xf32>
    tpu.vector_store %arg7[%c0_16, %c0_17, %c0_18], %37 {strides = array<i32>} : memref<1x4x128xf32, #tpu.memory_space<vmem>>, vector<1x4x128xf32>,
    %c0_19 = arith.constant 0 : index
    %c0_20 = arith.constant 0 : index
    %c0_21 = arith.constant 0 : index
    %39 = vector.load %arg8[%c0_19, %c0_20, %c0_21] : memref<1x4x128xf32, #tpu.memory_space<vmem>>, vector<1x4x128xf32>
    %cst_22 = arith.constant dense<0.000000e+00> : vector<1x4x128xf32>
    %40 = vector.multi_reduction <add>, %34, %cst_22 [2] : vector<1x4x32x128xf32> to vector<1x4x128xf32>
    %41 = arith.addf %39, %40 : vector<1x4x128xf32>
    %c0_23 = arith.constant 0 : index
    %c0_24 = arith.constant 0 : index
    %c0_25 = arith.constant 0 : index
    %42 = vector.load %arg8[%c0_23, %c0_24, %c0_25] : memref<1x4x128xf32, #tpu.memory_space<vmem>>, vector<1x4x128xf32>
    tpu.vector_store %arg8[%c0_23, %c0_24, %c0_25], %41 {strides = array<i32>} : memref<1x4x128xf32, #tpu.memory_space<vmem>>, vector<1x4x128xf32>,
    %c0_i32_26 = arith.constant 0 : i32
    %43 = arith.cmpi eq, %arg2, %c0_i32_26 : i32
    %44 = arith.extui %43 : i1 to i32
    %c0_i32_27 = arith.constant 0 : i32
    %45 = arith.cmpi ne, %44, %c0_i32_27 : i32
    scf.if %45 {
      %c0_28 = arith.constant 0 : index
      %c0_29 = arith.constant 0 : index
      %c0_30 = arith.constant 0 : index
      %46 = vector.load %arg7[%c0_28, %c0_29, %c0_30] : memref<1x4x128xf32, #tpu.memory_space<vmem>>, vector<1x4x128xf32>
      %cst_31 = arith.constant dense<0.000000e+00> : vector<1x4xf32>
      %47 = vector.multi_reduction <add>, %46, %cst_31 [2] : vector<1x4x128xf32> to vector<1x4xf32>
      %c0_32 = arith.constant 0 : index
      %c0_33 = arith.constant 0 : index
      %c0_34 = arith.constant 0 : index
      %c0_35 = arith.constant 0 : index
      %48 = vector.load %arg5[%c0_32, %c0_33, %c0_34, %c0_35] : memref<1x1x1x4xf32, #tpu.memory_space<vmem>>, vector<1x1x1x4xf32>
      %49 = vector.shape_cast %48 : vector<1x1x1x4xf32> to vector<1x4xf32>
      %50 = vector.shape_cast %47 : vector<1x4xf32> to vector<1x1x1x4xf32>
      tpu.vector_store %arg5[%c0_32, %c0_33, %c0_34, %c0_35], %50 {strides = array<i32>} : memref<1x1x1x4xf32, #tpu.memory_space<vmem>>, vector<1x1x1x4xf32>,
      %c0_36 = arith.constant 0 : index
      %c0_37 = arith.constant 0 : index
      %c0_38 = arith.constant 0 : index
      %51 = vector.load %arg8[%c0_36, %c0_37, %c0_38] : memref<1x4x128xf32, #tpu.memory_space<vmem>>, vector<1x4x128xf32>
      %cst_39 = arith.constant dense<0.000000e+00> : vector<1x4xf32>
      %52 = vector.multi_reduction <add>, %51, %cst_39 [2] : vector<1x4x128xf32> to vector<1x4xf32>
      %c0_40 = arith.constant 0 : index
      %c0_41 = arith.constant 0 : index
      %c0_42 = arith.constant 0 : index
      %c0_43 = arith.constant 0 : index
      %53 = vector.load %arg6[%c0_40, %c0_41, %c0_42, %c0_43] : memref<1x1x1x4xf32, #tpu.memory_space<vmem>>, vector<1x1x1x4xf32>
      %54 = vector.shape_cast %53 : vector<1x1x1x4xf32> to vector<1x4xf32>
      %55 = vector.shape_cast %52 : vector<1x4xf32> to vector<1x1x1x4xf32>
      tpu.vector_store %arg6[%c0_40, %c0_41, %c0_42, %c0_43], %55 {strides = array<i32>} : memref<1x1x1x4xf32, #tpu.memory_space<vmem>>, vector<1x1x1x4xf32>,
    } else {
    }
    return
  }
  func.func @transform_0(%arg0: i32, %arg1: i32, %arg2: i32) -> (i32, i32, i32, i32) {
    %c1_i32 = arith.constant 1 : i32
    %0 = arith.muli %arg1, %c1_i32 : i32
    %1 = arith.addi %0, %arg2 : i32
    %c0_i32 = arith.constant 0 : i32
    %c0_i32_0 = arith.constant 0 : i32
    %c0_i32_1 = arith.constant 0 : i32
    return %arg0, %c0_i32, %1, %c0_i32_0 : i32, i32, i32, i32
  }
  func.func @transform_1(%arg0: i32, %arg1: i32, %arg2: i32) -> (i32, i32, i32, i32) {
    %c1_i32 = arith.constant 1 : i32
    %0 = arith.muli %arg1, %c1_i32 : i32
    %1 = arith.addi %0, %arg2 : i32
    %c0_i32 = arith.constant 0 : i32
    %c0_i32_0 = arith.constant 0 : i32
    %c0_i32_1 = arith.constant 0 : i32
    return %arg0, %c0_i32, %1, %c0_i32_0 : i32, i32, i32, i32
  }
  func.func @transform_2(%arg0: i32, %arg1: i32, %arg2: i32) -> (i32, i32, i32, i32) {
    %c0_i32 = arith.constant 0 : i32
    %c0_i32_0 = arith.constant 0 : i32
    %c0_i32_1 = arith.constant 0 : i32
    return %arg0, %arg1, %c0_i32, %c0_i32_0 : i32, i32, i32, i32
  }
  func.func @transform_3(%arg0: i32, %arg1: i32, %arg2: i32) -> (i32, i32, i32, i32) {
    %c0_i32 = arith.constant 0 : i32
    %c0_i32_0 = arith.constant 0 : i32
    %c0_i32_1 = arith.constant 0 : i32
    return %arg0, %arg1, %c0_i32, %c0_i32_0 : i32, i32, i32, i32
  }
}

</mosaic_0001>

<bundles_post_ra>
// kernel: tpu_custom_call.1
= control target key start
LH: loop header
LB: loop body
LE: loop exit
PB: predicated region body
PF: predicated region fallthrough
CT: control target
= control target key end

     0   :  { %9 = vsyncpa [#allocation5], 0  ;;  %s1713_s0 = inlined_call_operand.hbm [shape: f32[2,4,32,128], index: 0, kind: input, shape index: {}]   ;;  %s1714_s1 = inlined_call_operand.hbm [shape: s8[2,1,32,128], index: 1, kind: input, shape index: {}]   ;;  %s1715_s2 = inlined_call_operand.hbm [shape: f32[2,1,1,4], index: 2, kind: output, shape index: {0}]   ;;  %s1716_s3 = inlined_call_operand.hbm [shape: f32[2,1,1,4], index: 3, kind: output, shape index: {1}]  }
   0x1   :  { %11 = vsyncpa [#allocation5 + $0x1], 0 }
   0x2   :  { %12 = vsyncpa [#allocation8], 0 }
   0x3   :  { %14 = vsyncpa [#allocation8 + $0x1], 0 }
   0x4   :  { %15 = vsyncpa [#allocation6], 0 }
   0x5   :  { %17 = vsyncpa [#allocation6 + $0x1], 0 }
   0x6   :  { %18 = vsyncpa [#allocation11], 0 }
   0x7   :  { %20 = vsyncpa [#allocation11 + $0x1], 0  ;;  %s1178_s12 = smov 0   ;;  %s1180_s13 = smov 0  }
   0x8   :  { %s1182_s14 = smov 0   ;;  %s1184_s15 = smov 0  }
   0x9   :  { %s1186_s16 = smov 0   ;;  %s1188_s17 = smov 0  }
   0xa LB: > { %s823_s18 = sadd.s32 4294967295, %s1149_s17   ;;  %s824_s19 = sadd.s32 4294967294, %s1149_s17   ;;  %s1149_s17 = sphi %s1188_s17, %s26_s17   ;;  %s1145_s16 = sphi %s1186_s16, %s1745_s16   ;;  %s1141_s15 = sphi %s1184_s15, %s1744_s15   ;;  %s1137_s14 = sphi %s1182_s14, %s1743_s14   ;;  %s1133_s13 = sphi %s1180_s13, %s1742_s13   ;;  %s1129_s12 = sphi %s1178_s12, %s1741_s12  }
   0xb   : > { %s45_s20 = sadd.s32 1, %s1145_s16  ;;  %s56_s21 = sadd.s32 1, %s1137_s14 }
   0xc   : > { %p47_p0 = scmp.ge.s32.totalorder %s45_s20, 2  ;;  %p63_p1 = scmp.ne.s32.totalorder %s1137_s14, %s1133_s13 }
   0xd   : > { %p64_p2 = scmp.eq.s32.totalorder %s1149_s17, 0  ;;  %p69_p3 = scmp.ne.s32.totalorder %s1133_s13, %s1129_s12 }
   0xe   : > { %s1747_s20 = smov (%p47_p0, %s45_s20), 0  ;;  %p70_p5 = scmp.eq.s32.totalorder %s823_s18, 0 }
   0xf   : > { %p1219_p4 = por %p64_p2, %p63_p1  ;;  %s51_s23 = ssub.s32 %s1145_s16, %s1747_s20 }
  0x10   : > { %p125_p6 = scmp.eq.s32.totalorder %s823_s18, 1  ;;  %p54_p7 = scmp.eq.s32.totalorder %s51_s23, 0 }
  0x11   : > { %p1225_p8 = por %p70_p5, %p69_p3  ;;  %p131_p10 = scmp.eq.s32.totalorder %s824_s19, 1 }
  0x12   : > { %p1229_p9 = por %p125_p6, %p63_p1  ;;  %p878_p13 = scmp.lt.s32.totalorder %s1149_s17, 2 }
  0x13   : > { %s1723_s24 = scalar_select %p1225_p8, 1, 0 }
  0x14   : > { %s1724_s25 = scalar_select %p1229_p9, 1, 0 }
  0x15   : > { %s1234_s26 = scalar_select %p54_p7, %s1137_s14, %s56_s21  }
  0x16   : > { %p1236_p11 = por %p131_p10, %p69_p3  ;;  %s1243_s28 = sand.u32 1, %s1137_s14  }
  0x17   : > { %s827_s29 = sshll.u32 %s1243_s28, 7  ;;  %s855_s30 = sshll.u32 %s1145_s16, 11 }
  0x18   : > { %s1725_s27 = scalar_select %p1236_p11, 1, 0 }
  0x19   : > { %s1250_s6 = scalar_lea.hbm %s1713_s0, %s855_s30  ;;  %s183_s7 = scalar_lea.vmem [#allocation4], %s827_s29 }
  0x1a   : > { %s193_s8 = sshll.u32 %s183_s7, 4  ;;  %p1256_p0 = pnand %p878_p13, %p1219_p4  ;;  %s1252_s8 = int_to_ptr.vmem [resolvable:$true] %s193_s8 }
  0x1b   : > { %s180_s10 = scalar_lea.sflag [#allocation5], %s1243_s28  ;;  %s971_s11 = scalar_lea.hbm %s1250_s6, 2048 }
  0x1c   : > { %p972_p2 = scmp.ne.s32.totalorder %s1250_s6, %s971_s11  ;;  %p973_p3 = pneg %p1256_p0 }
  0x1d   : > { %s976_s21 = scalar_lea.hbm %s1713_s0, 4096  ;;  %p977_p4 = scmp.lt.u32.totalorder %s1250_s6, %s1713_s0 }
  0x1e   : > { %p974_p5 = pnand %p973_p3, %p972_p2  ;;  %p978_p7 = scmp.lt.u32.totalorder %s976_s21, %s971_s11 }
  0x1f   : > { %p980_p13 = scmp.lt.u32.totalorder %s971_s11, %s1250_s6 }
  0x20   : > { %p975_p6 = pneg %p974_p5  ;;  %p979_p10 = por %p978_p7, %p977_p4 }
  0x22   : > { %p981_p12 = por %p980_p13, %p979_p10 }
  0x24   : > { %p982_p1 = pnand %p981_p12, %p975_p6 }
  0x26   : > { %985 = shalt.err (!%p982_p1)
}
  0x27   : > { %s986_s29 = scalar_lea.vmem %s1252_s8, 2048  ;;  %s1151_s30 = smov [#allocation4]  }
  0x28   : > { %p987_p2 = scmp.ne.s32.totalorder %s1252_s8, %s986_s29  ;;  %s991_s4 = sshll.u32 %s1151_s30, 4  ;;  %s992_s4 = int_to_ptr.vmem [resolvable:$false] %s991_s4 }
  0x29   : > { %s993_s5 = scalar_lea.vmem %s992_s4, 4096  ;;  %p994_p9 = scmp.lt.s32.totalorder %s1252_s8, %s992_s4 }
  0x2a   : > { %p989_p5 = pnand %p987_p2, %p973_p3  ;;  %p995_p4 = scmp.lt.s32.totalorder %s993_s5, %s986_s29 }
  0x2c   : > { %p990_p11 = pneg %p989_p5  ;;  %p996_p7 = por %p995_p4, %p994_p9 }
  0x2e   : > { %p997_p10 = pnand %p996_p7, %p990_p11 }
  0x30   : > { %1000 = shalt.err (!%p997_p10)
}
  0x31   : > { %s1152_s7 = smov 128   ;;  %s1153_s11 = smov 8  }
  0x32   : > { %867 = dma.hbm_to_vmem [thread:$0]  (!%p1256_p0), %s1250_s6, 2048, %s1252_s8, %s180_s10, %s1152_s7, %s1152_s7, %s1153_s11  }
  0x33   : > { %p221_p12 = scmp.lt.s32.totalorder %s1149_s17, 3  ;;  %s830_s18 = sshll.u32 %s1243_s28, 3 }
  0x34   : > { %s831_s19 = sshll.u32 %s1145_s16, 7  ;;  %p1727_p9 = scmp.ge.s32.totalorder %s1149_s17, 1 }
  0x35   : > { %s1301_s29 = scalar_lea.hbm %s1714_s1, %s831_s19  ;;  %s207_s30 = scalar_lea.vmem [#allocation7], %s830_s18 }
  0x36   : > { %p1294_p11 = pnand %p1727_p9, %p221_p12  ;;  %s216_s4 = sshll.u32 %s207_s30, 4  ;;  %s217_s4 = int_to_ptr.vmem [resolvable:$true] %s216_s4 }
  0x37   : > { %s204_s6 = scalar_lea.sflag [#allocation8], %s1243_s28  ;;  %s1001_s8 = scalar_lea.hbm %s1301_s29, 128 }
  0x38   : > { %s1728_s21 = scalar_select %p1294_p11, 1, 0 }
  0x39   : > { %p1002_p1 = scmp.ne.s32.totalorder %s1301_s29, %s1001_s8  ;;  %s1006_s7 = scalar_lea.hbm %s1714_s1, 256 }
  0x3a   : > { %p1007_p2 = scmp.lt.u32.totalorder %s1301_s29, %s1714_s1  ;;  %p1008_p5 = scmp.lt.u32.totalorder %s1006_s7, %s1001_s8 }
  0x3b   : > { %p1004_p6 = pnand %p1002_p1, %p973_p3  ;;  %p1010_p7 = scmp.lt.u32.totalorder %s1001_s8, %s1301_s29 }
  0x3c   : > { %p1009_p4 = por %p1008_p5, %p1007_p2 }
  0x3d   : > { %p1005_p13 = pneg %p1004_p6 }
  0x3e   : > { %p1011_p10 = por %p1010_p7, %p1009_p4 }
  0x40   : > { %p1012_p12 = pnand %p1011_p10, %p1005_p13 }
  0x42   : > { %1015 = shalt.err (!%p1012_p12)
}
  0x43   : > { %s1016_s28 = scalar_lea.vmem %s217_s4, 128  ;;  %s1154_s18 = smov [#allocation7]  }
  0x44   : > { %p1017_p9 = scmp.ne.s32.totalorder %s217_s4, %s1016_s28  ;;  %s1021_s22 = sshll.u32 %s1154_s18, 4  ;;  %s1022_s22 = int_to_ptr.vmem [resolvable:$false] %s1021_s22 }
  0x45   : > { %s1023_s23 = scalar_lea.vmem %s1022_s22, 256  ;;  %p1024_p8 = scmp.lt.s32.totalorder %s217_s4, %s1022_s22 }
  0x46   : > { %p1019_p1 = pnand %p1017_p9, %p973_p3  ;;  %p1025_p11 = scmp.lt.s32.totalorder %s1023_s23, %s1016_s28 }
  0x48   : > { %p1020_p6 = pneg %p1019_p1  ;;  %p1026_p2 = por %p1025_p11, %p1024_p8 }
  0x4a   : > { %p1027_p5 = pnand %p1026_p2, %p1020_p6 }
  0x4c   : > { %1030 = shalt.err (!%p1027_p5)
}
  0x4d   : > { %870 = dma.hbm_to_vmem [thread:$0]  (!%p1256_p0), %s1301_s29, 128, %s217_s4, %s204_s6  }
  0x4e   : > { %p1729_p13 = scmp.ne.s32.totalorder %s1728_s21, 0 }
  0x4f   : > { %s1326_s30 = sand.u32 (!%p1729_p13), 1, %s1133_s13   ;;  %p1730_p8 = scmp.ne.s32.totalorder (!%p1729_p13), %s1723_s24, 0 }
  0x50   : > { %225 = sbr.rel (%p1729_p13) target bundleno = 373 (0x175), region = 28  ;;  %s833_s8 = sshll.u32 (!%p1729_p13), %s1326_s30, 7 }
  0x51   : > { %s228_s10 = scalar_lea.sflag (!%p1729_p13), [#allocation5], %s1326_s30  ;;  %s1330_s5 = scalar_lea.vmem (!%p1729_p13), [#allocation4], %s833_s8 }
  0x57   : > { %1112 = dma.done.wait (%p1730_p8), %s228_s10, 2048  }
  0x58   : > { %1114 = vsyncadd (%p1730_p8), %s228_s10, 4294965248  ;;  %s834_s9 = sshll.u32 %s1326_s30, 3  ;;  %s237_s21 = scalar_lea.sflag [#allocation8], %s1326_s30 }
  0x59   : > { %s1338_s29 = scalar_lea.vmem [#allocation7], %s834_s9 }
  0x5a   : > { %1116 = dma.done.wait (%p1730_p8), %s237_s21, 128  }
  0x5b   : > { %1118 = vsyncadd (%p1730_p8), %s237_s21, 4294967168  ;;  %v1155_v0 = vmov 0.0   ;;  %v280_v1 = vld [vmem:[%s1330_s5] sm:$0xff]  ;;  %v281_v2 = vld [vmem:[%s1330_s5 + $0x8] sm:$0xff]  ;;  %s851_s24 = sshll.u32 %s1141_s15, 4  ;;  %s264_s4 = scalar_lea.vmem [#allocation9], %s1326_s30 }
  0x5c   : > { %278 = vst [vmem:[#allocation2] sm:$0xf] %v1155_v0  ;;  %279 = vst [vmem:[#allocation3] sm:$0xf] %v1155_v0  ;;  %v282_v3 = vld [vmem:[%s1330_s5 + $0x10] sm:$0xff]  ;;  %v283_v4 = vld [vmem:[%s1330_s5 + $0x18] sm:$0xff]  ;;  %s1630_s19 = scalar_lea.hbm %s1715_s2, %s851_s24 }
  0x5d   : > { %v284_v5 = vld [vmem:[%s1330_s5 + $0x20] sm:$0xff]  ;;  %v285_v6 = vld [vmem:[%s1330_s5 + $0x28] sm:$0xff]  ;;  %v286_v7 = vld [vmem:[%s1330_s5 + $0x30] sm:$0xff]  ;;  %s673_s6 = sshll.u32 %s264_s4, 4  ;;  %s656_s28 = scalar_lea.sflag [#allocation6], %s1326_s30  ;;  %s1632_s6 = int_to_ptr.vmem [resolvable:$true] %s673_s6 }
  0x5e   : > { %v287_v8 = vld [vmem:[%s1330_s5 + $0x38] sm:$0xff]  ;;  %v288_v9 = vld [vmem:[%s1330_s5 + $0x40] sm:$0xff]  ;;  %v301_v10 = vmax.f32 %v280_v1, %v284_v5  ;;  %v304_v11 = vmax.f32 %v281_v2, %v285_v6  ;;  %v289_v12 = vld [vmem:[%s1330_s5 + $0x48] sm:$0xff]  ;;  %v307_v15 = vmax.f32 %v282_v3, %v286_v7  ;;  %s1031_s18 = scalar_lea.vmem %s1632_s6, 16  ;;  %p1738_p3 = scmp.ne.s32.totalorder %s1724_s25, 0 }
  0x5f   : > { %v290_v13 = vld [vmem:[%s1330_s5 + $0x50] sm:$0xff]  ;;  %v291_v14 = vld [vmem:[%s1330_s5 + $0x58] sm:$0xff]  ;;  %v310_v16 = vmax.f32 %v283_v4, %v287_v8  ;;  %v292_v17 = vld [vmem:[%s1330_s5 + $0x60] sm:$0xff]  ;;  %p1032_p0 = scmp.ne.s32.totalorder %s1632_s6, %s1031_s18  ;;  %s1156_s22 = smov [#allocation9]  }
  0x60   : > { %v293_v18 = vld [vmem:[%s1330_s5 + $0x68] sm:$0xff]  ;;  %v294_v19 = vld [vmem:[%s1330_s5 + $0x70] sm:$0xff]  ;;  %v302_v20 = vmax.f32 %v301_v10, %v288_v9  ;;  %v305_v21 = vmax.f32 %v304_v11, %v289_v12  ;;  %v295_v22 = vld [vmem:[%s1330_s5 + $0x78] sm:$0xff]  ;;  %v308_v23 = vmax.f32 %v307_v15, %v290_v13  ;;  %s1035_s23 = sshll.u32 %s1156_s22, 4  ;;  %s1036_s23 = int_to_ptr.vmem [resolvable:$false] %s1035_s23 }
  0x61   : > { %v311_v24 = vmax.f32 %v310_v16, %v291_v14  ;;  %p1033_p11 = pnand %p1032_p0, %p1738_p3  ;;  %s1037_s8 = scalar_lea.vmem %s1036_s23, 32 }
  0x62   : > { %v303_v25 = vmax.f32 %v302_v20, %v292_v17  ;;  %v306_v26 = vmax.f32 %v305_v21, %v293_v18  ;;  %v309_v27 = vmax.f32 %v308_v23, %v294_v19  ;;  %p1038_p7 = scmp.lt.s32.totalorder %s1632_s6, %s1036_s23  ;;  %p1039_p10 = scmp.lt.s32.totalorder %s1037_s8, %s1031_s18 }
  0x63   : > { %v312_v28 = vmax.f32 %v311_v24, %v295_v22  ;;  %p1034_p4 = pneg %p1033_p11 }
  0x64   : > { %v313_v29 = vsub.f32 %v280_v1, %v303_v25  ;;  %v314_v30 = vsub.f32 %v281_v2, %v306_v26  ;;  %v315_v31 = vsub.f32 %v282_v3, %v309_v27  ;;  %v317_v33 = vsub.f32 %v284_v5, %v303_v25  ;;  %p1040_p12 = por %p1039_p10, %p1038_p7 }
  0x65   : > { %v316_v32 = vsub.f32 %v283_v4, %v312_v28  ;;  %v318_v34 = vsub.f32 %v285_v6, %v306_v26  ;;  %v319_v35 = vsub.f32 %v286_v7, %v309_v27  ;;  %v320_v39 = vsub.f32 %v287_v8, %v312_v28 }
  0x66   : > { %v329_v36 = vmul.f32 1.442695, %v313_v29  ;;  %v331_v37 = vmul.f32 1.442695, %v314_v30  ;;  %v333_v38 = vmul.f32 1.442695, %v315_v31  ;;  %v321_v41 = vsub.f32 %v288_v9, %v303_v25  ;;  %p1041_p9 = pnand %p1040_p12, %p1034_p4 }
  0x67   : > { %v335_v40 = vmul.f32 1.442695, %v316_v32  ;;  %v337_v42 = vmul.f32 1.442695, %v317_v33  ;;  %v322_v43 = vsub.f32 %v289_v12, %v306_v26  ;;  %v339_v44 = vmul.f32 1.442695, %v318_v34 }
  0x68   : > { %931 = vpow2.f32 %v329_v36  ;;  %v323_v45 = vsub.f32 %v290_v13, %v309_v27  ;;  %v341_v46 = vmul.f32 1.442695, %v319_v35  ;;  %v324_v47 = vsub.f32 %v291_v14, %v312_v28 }
  0x69   : > { %933 = vpow2.f32 %v331_v37  ;;  %v343_v48 = vmul.f32 1.442695, %v320_v39  ;;  %v325_v49 = vsub.f32 %v292_v17, %v303_v25  ;;  %v345_v50 = vmul.f32 1.442695, %v321_v41 }
  0x6a   : > { %935 = vpow2.f32 %v333_v38  ;;  %v326_v51 = vsub.f32 %v293_v18, %v306_v26  ;;  %v347_v52 = vmul.f32 1.442695, %v322_v43  ;;  %v327_v53 = vsub.f32 %v294_v19, %v309_v27 }
  0x6b   : > { %937 = vpow2.f32 %v335_v40  ;;  %v349_v54 = vmul.f32 1.442695, %v323_v45  ;;  %v328_v55 = vsub.f32 %v295_v22, %v312_v28  ;;  %v351_v56 = vmul.f32 1.442695, %v324_v47  ;;  %v296_v22 = vld [vmem:[%s1338_s29] sm:$0xff] }
  0x6c   : > { %939 = vpow2.f32 %v337_v42  ;;  %v353_v57 = vmul.f32 1.442695, %v325_v49  ;;  %v355_v58 = vmul.f32 1.442695, %v326_v51  ;;  %v357_v60 = vmul.f32 1.442695, %v327_v53 }
  0x6d   : > { %941 = vpow2.f32 %v339_v44  ;;  %v359_v62 = vmul.f32 1.442695, %v328_v55  ;;  %v1411_v27 = vunpack.c.0.s8 %v296_v22  ;;  %v1413_v28 = vunpack.c.1.s8 %v296_v22 }
  0x6e   : > { %943 = vpow2.f32 %v341_v46  ;;  %v1415_v29 = vunpack.c.2.s8 %v296_v22  ;;  %v1417_v30 = vunpack.c.3.s8 %v296_v22 }
  0x6f   : > { %945 = vpow2.f32 %v343_v48  ;;  %vm405_vm0 = vcmp.eq.s32.totalorder %v1411_v27, 0  ;;  %vm406_vm1 = vcmp.eq.s32.totalorder %v1413_v28, 0  ;;  %vm409_vm4 = vcmp.eq.s32.totalorder %v1411_v27, 1 }
  0x70   : > { %947 = vpow2.f32 %v345_v50  ;;  %vm407_vm2 = vcmp.eq.s32.totalorder %v1415_v29, 0  ;;  %vm408_vm3 = vcmp.eq.s32.totalorder %v1417_v30, 0  ;;  %vm410_vm5 = vcmp.eq.s32.totalorder %v1413_v28, 1 }
  0x71   : > { %949 = vpow2.f32 %v347_v52  ;;  %vm411_vm6 = vcmp.eq.s32.totalorder %v1415_v29, 1  ;;  %vm412_vm7 = vcmp.eq.s32.totalorder %v1417_v30, 1  ;;  %vm413_vm8 = vcmp.eq.s32.totalorder %v1411_v27, 2 }
  0x72   : > { %v1362_v59 = vpop.eup %931  ;;  %951 = vpow2.f32 %v349_v54  ;;  %vm414_vm9 = vcmp.eq.s32.totalorder %v1413_v28, 2  ;;  %vm415_vm10 = vcmp.eq.s32.totalorder %v1415_v29, 2  ;;  %vm1721_vm11 = vcmp.eq.s32.totalorder %v1417_v30, 2 }
  0x73   : > { %v1364_v61 = vpop.eup %933  ;;  %953 = vpow2.f32 %v351_v56  ;;  %vm417_vm12 = vcmp.eq.s32.totalorder %v1411_v27, 3  ;;  %vm418_vm13 = vcmp.eq.s32.totalorder %v1413_v28, 3  ;;  %vm1719_vm14 = vcmp.eq.s32.totalorder %v1415_v29, 3 }
  0x74   : > { %v1366_v63 = vpop.eup %935  ;;  %955 = vpow2.f32 %v353_v57  ;;  %vm1720_vm15 = vcmp.eq.s32.totalorder %v1417_v30, 3  ;;  %v1438_v32 = vsel %vm405_vm0, 1.0, %v1155_v0  ;;  %v1443_v35 = vsel %vm406_vm1, 1.0, %v1155_v0 }
  0x75   : > { %v1368_v1 = vpop.eup %937  ;;  %957 = vpow2.f32 %v355_v58  ;;  %v1448_v36 = vsel %vm407_vm2, 1.0, %v1155_v0  ;;  %v1453_v37 = vsel %vm408_vm3, 1.0, %v1155_v0  ;;  %v1458_v40 = vsel %vm409_vm4, 1.0, %v1155_v0 }
  0x76   : > { %v1370_v2 = vpop.eup %939  ;;  %959 = vpow2.f32 %v357_v60  ;;  %v1463_v41 = vsel %vm410_vm5, 1.0, %v1155_v0  ;;  %v1468_v42 = vsel %vm411_vm6, 1.0, %v1155_v0  ;;  %v1473_v46 = vsel %vm412_vm7, 1.0, %v1155_v0 }
  0x77   : > { %v1372_v3 = vpop.eup %941  ;;  %961 = vpow2.f32 %v359_v62  ;;  %v361_v4 = vadd.f32 %v1370_v2, %v1362_v59  ;;  %v1478_v47 = vsel %vm413_vm8, 1.0, %v1155_v0  ;;  %v1483_v50 = vsel %vm414_vm9, 1.0, %v1155_v0 }
  0x78   : > { %v1376_v5 = vpop.eup %943  ;;  %v364_v6 = vadd.f32 %v1372_v3, %v1364_v61  ;;  %v1488_v51 = vsel %vm415_vm10, 1.0, %v1155_v0  ;;  %v1493_v54 = vsel %vm1721_vm11, 1.0, %v1155_v0  ;;  %v1498_v55 = vsel %vm417_vm12, 1.0, %v1155_v0 }
  0x79   : > { %v1380_v7 = vpop.eup %945  ;;  %v367_v8 = vadd.f32 %v1376_v5, %v1366_v63  ;;  %v1503_v58 = vsel %vm418_vm13, 1.0, %v1155_v0  ;;  %v1508_v60 = vsel %vm1719_vm14, 1.0, %v1155_v0  ;;  %vm423_vm11 = vcmp.lt.s32.totalorder %v1415_v29, 4 }
  0x7a   : > { %v1384_v9 = vpop.eup %947  ;;  %v370_v10 = vadd.f32 %v1380_v7, %v1368_v1  ;;  %vm424_vm14 = vcmp.lt.s32.totalorder %v1417_v30, 4 }
  0x7b   : > { %v1388_v11 = vpop.eup %949  ;;  %v362_v12 = vadd.f32 %v1384_v9, %v361_v4 }
  0x7c   : > { %v1391_v13 = vpop.eup %951  ;;  %v365_v14 = vadd.f32 %v1388_v11, %v364_v6 }
  0x7d   : > { %v1394_v15 = vpop.eup %953  ;;  %v368_v16 = vadd.f32 %v1391_v13, %v367_v8  ;;  %v1515_v8 = vsel %vm1720_vm15, 1.0, %v1155_v0  ;;  %vm422_vm15 = vcmp.lt.s32.totalorder %v1413_v28, 4 }
  0x7e   : > { %v1397_v17 = vpop.eup %955  ;;  %v371_v18 = vadd.f32 %v1394_v15, %v370_v10 }
  0x7f   : > { %v1400_v19 = vpop.eup %957  ;;  %v363_v20 = vadd.f32 %v1397_v17, %v362_v12 }
  0x80   : > { %v1403_v21 = vpop.eup %959  ;;  %v366_v23 = vadd.f32 %v1400_v19, %v365_v14 }
  0x81   : > { %v1407_v24 = vpop.eup %961  ;;  %v369_v25 = vadd.f32 %v1403_v21, %v368_v16  ;;  %963 = vrcp.f32 %v363_v20 }
  0x82   : > { %v372_v26 = vadd.f32 %v1407_v24, %v371_v18  ;;  %965 = vrcp.f32 %v366_v23 }
  0x83   : > { %967 = vrcp.f32 %v369_v25 }
  0x84   : > { %969 = vrcp.f32 %v372_v26 }
  0x8b   : > { %v964_v31 = vpop.eup %963 }
  0x8c   : > { %v966_v33 = vpop.eup %965  ;;  %v377_v34 = vmul.f32 %v964_v31, %v363_v20 }
  0x8d   : > { %v968_v38 = vpop.eup %967  ;;  %v378_v39 = vmul.f32 %v966_v33, %v366_v23 }
  0x8e   : > { %v970_v43 = vpop.eup %969  ;;  %v379_v44 = vmul.f32 %v968_v38, %v369_v25  ;;  %v381_v45 = vsub.f32 2.0, %v377_v34 }
  0x8f   : > { %v380_v48 = vmul.f32 %v970_v43, %v372_v26  ;;  %v382_v49 = vsub.f32 2.0, %v378_v39 }
  0x90   : > { %v383_v52 = vsub.f32 2.0, %v379_v44  ;;  %v385_v53 = vmul.f32 %v964_v31, %v381_v45 }
  0x91   : > { %v384_v56 = vsub.f32 2.0, %v380_v48  ;;  %v386_v57 = vmul.f32 %v966_v33, %v382_v49 }
  0x92   : > { %v387_v62 = vmul.f32 %v968_v38, %v383_v52  ;;  %v389_v4 = vmul.f32 %v1362_v59, %v385_v53  ;;  %v393_v6 = vmul.f32 %v1370_v2, %v385_v53  ;;  %v397_v16 = vmul.f32 %v1384_v9, %v385_v53 }
  0x93   : > { %v388_v10 = vmul.f32 %v970_v43, %v384_v56  ;;  %v390_v12 = vmul.f32 %v1364_v61, %v386_v57  ;;  %v394_v14 = vmul.f32 %v1372_v3, %v386_v57  ;;  %v398_v59 = vmul.f32 %v1388_v11, %v386_v57 }
  0x94   : > { %v391_v18 = vmul.f32 %v1366_v63, %v387_v62  ;;  %v395_v20 = vmul.f32 %v1376_v5, %v387_v62  ;;  %v399_v2 = vmul.f32 %v1391_v13, %v387_v62  ;;  %v401_v3 = vmul.f32 %v1397_v17, %v385_v53 }
  0x95   : > { %v392_v0 = vmul.f32 %v1368_v1, %v388_v10  ;;  %v396_v22 = vmul.f32 %v1380_v7, %v388_v10  ;;  %v400_v61 = vmul.f32 %v1394_v15, %v388_v10  ;;  %v402_v63 = vmul.f32 %v1400_v19, %v386_v57 }
  0x96   : > { %v403_v5 = vmul.f32 %v1403_v21, %v387_v62  ;;  %v404_v9 = vmul.f32 %v1407_v24, %v388_v10  ;;  %v425_v11 = vmul.f32 %v389_v4, %v389_v4  ;;  %v426_v1 = vmul.f32 %v390_v12, %v390_v12 }
  0x97   : > { %v427_v13 = vmul.f32 %v391_v18, %v391_v18  ;;  %v428_v7 = vmul.f32 %v392_v0, %v392_v0  ;;  %v429_v23 = vmul.f32 %v393_v6, %v393_v6  ;;  %v430_v15 = vmul.f32 %v394_v14, %v394_v14 }
  0x98   : > { %v431_v25 = vmul.f32 %v395_v20, %v395_v20  ;;  %v432_v17 = vmul.f32 %v396_v22, %v396_v22  ;;  %v433_v26 = vmul.f32 %v397_v16, %v397_v16  ;;  %v434_v31 = vmul.f32 %v398_v59, %v398_v59 }
  0x99   : > { %v435_v33 = vmul.f32 %v399_v2, %v399_v2  ;;  %v436_v34 = vmul.f32 %v400_v61, %v400_v61  ;;  %v437_v38 = vmul.f32 %v401_v3, %v401_v3  ;;  %v438_v19 = vmul.f32 %v402_v63, %v402_v63 }
  0x9a   : > { %v439_v39 = vmul.f32 %v403_v5, %v403_v5  ;;  %v440_v21 = vmul.f32 %v404_v9, %v404_v9  ;;  %v441_v24 = vsel %vm405_vm0, %v389_v4, 0.0  ;;  %v442_v43 = vsel %vm406_vm1, %v390_v12, 0.0 }
  0x9b   : > { %v443_v44 = vsel %vm407_vm2, %v391_v18, 0.0  ;;  %v445_v45 = vsel %vm409_vm4, %v393_v6, 0.0  ;;  %v446_v48 = vsel %vm410_vm5, %v394_v14, 0.0  ;;  %v444_v49 = vsel %vm408_vm3, %v392_v0, 0.0 }
  0x9c   : > { %v447_v52 = vsel %vm411_vm6, %v395_v20, 0.0  ;;  %v449_v53 = vsel %vm413_vm8, %v397_v16, 0.0  ;;  %v450_v56 = vsel %vm414_vm9, %v398_v59, 0.0  ;;  %v448_v57 = vsel %vm412_vm7, %v396_v22, 0.0 }
  0x9d   : > { %v451_v62 = vsel %vm415_vm10, %v399_v2, 0.0  ;;  %v453_v4 = vsel %vm417_vm12, %v401_v3, 0.0  ;;  %v454_v6 = vsel %vm418_vm13, %v402_v63, 0.0  ;;  %vm1731_vm0 = vcmp.eq.s32.totalorder %v1417_v30, 2 }
  0x9e   : > { %v452_v10 = vsel %vm1731_vm0, %v400_v61, 0.0  ;;  %vm1732_vm1 = vcmp.eq.s32.totalorder %v1415_v29, 3  ;;  %v530_v14 = vadd.f32 %v442_v43, %v441_v24  ;;  %v539_v16 = vadd.f32 %v446_v48, %v445_v45 }
  0x9f   : > { %v455_v12 = vsel %vm1732_vm1, %v403_v5, 0.0  ;;  %vm1733_vm2 = vcmp.eq.s32.totalorder %v1417_v30, 3  ;;  %v548_v20 = vadd.f32 %v450_v56, %v449_v53  ;;  %v557_v59 = vadd.f32 %v454_v6, %v453_v4 }
  0xa0   : > { %v456_v18 = vsel %vm1733_vm2, %v404_v9, 0.0  ;;  %vm1734_vm3 = vcmp.lt.s32.totalorder %v1411_v27, 4  ;;  %v531_v0 = vadd.f32 %v530_v14, %v443_v44  ;;  %v540_v22 = vadd.f32 %v539_v16, %v447_v52 }
  0xa1   : > { %v465_v2 = vsel %vm1734_vm3, %v425_v11, 0.0  ;;  %v466_v3 = vsel %vm422_vm15, %v426_v1, 0.0  ;;  %v467_v61 = vsel %vm423_vm11, %v427_v13, 0.0  ;;  %v549_v63 = vadd.f32 %v548_v20, %v451_v62  ;;  %vm1735_vm4 = vmmov %vm1734_vm3 }
  0xa2   : > { %v558_v5 = vadd.f32 %v557_v59, %v455_v12  ;;  %v468_v24 = vsel %vm424_vm14, %v428_v7, 0.0  ;;  %v469_v9 = vsel %vm1735_vm4, %v429_v23, 0.0  ;;  %v532_v43 = vadd.f32 %v531_v0, %v444_v49  ;;  %vm1736_vm5 = vmmov %vm1734_vm3 }
  0xa3   : > { %v541_v45 = vadd.f32 %v540_v22, %v448_v57  ;;  %v470_v11 = vsel %vm422_vm15, %v430_v15, 0.0  ;;  %v471_v44 = vsel %vm423_vm11, %v431_v25, 0.0  ;;  %v550_v1 = vadd.f32 %v549_v63, %v452_v10  ;;  %vm1737_vm7 = vmmov %vm1734_vm3 }
  0xa4   : > { %v559_v48 = vadd.f32 %v558_v5, %v456_v18  ;;  %v472_v13 = vsel %vm424_vm14, %v432_v17, 0.0  ;;  %v473_v52 = vsel %vm1736_vm5, %v433_v26, 0.0  ;;  %v533_v7 = vrot.slane %v532_v43, 4 }
  0xa5   : > { %v542_v53 = vrot.slane %v541_v45, 4  ;;  %v474_v23 = vsel %vm422_vm15, %v434_v31, 0.0  ;;  %v475_v49 = vsel %vm423_vm11, %v435_v33, 0.0  ;;  %v551_v15 = vrot.slane %v550_v1, 4 }
  0xa6   : > { %v560_v56 = vrot.slane %v559_v48, 4  ;;  %vm570_vm6 = vcmask 1041409   ;;  %v476_v25 = vsel %vm424_vm14, %v436_v34, 0.0  ;;  %v477_v17 = vsel %vm1737_vm7, %v437_v38, 0.0 }
  0xa7   : > { %v534_v57 = vadd.f32 %v533_v7, %v532_v43  ;;  %v543_v62 = vadd.f32 %v542_v53, %v541_v45  ;;  %vm572_vm8 = vcmask 1042434   ;;  %v478_v26 = vsel %vm422_vm15, %v438_v19, 0.0 }
  0xa8   : > { %v479_v31 = vsel %vm423_vm11, %v439_v39, 0.0  ;;  %v552_v4 = vadd.f32 %v551_v15, %v550_v1  ;;  %v561_v33 = vadd.f32 %v560_v56, %v559_v48  ;;  %vm574_vm9 = vcmask 1043459  }
  0xa9   : > { %v480_v6 = vsel %vm424_vm14, %v440_v21, 0.0  ;;  %v513_v34 = vadd.f32 %v1438_v32, %v465_v2  ;;  %v535_v10 = vrot.slane %v534_v57, 2  ;;  %v544_v27 = vrot.slane %v543_v62, 2 }
  0xaa   : > { %v514_v38 = vadd.f32 %v1443_v35, %v466_v3  ;;  %v515_v12 = vadd.f32 %v1448_v36, %v467_v61  ;;  %v553_v14 = vrot.slane %v552_v4, 2  ;;  %v562_v28 = vrot.slane %v561_v33, 2 }
  0xab   : > { %v516_v19 = vadd.f32 %v1453_v37, %v468_v24  ;;  %v517_v29 = vadd.f32 %v1458_v40, %v469_v9  ;;  %v536_v39 = vadd.f32 %v535_v10, %v534_v57  ;;  %v545_v16 = vadd.f32 %v544_v27, %v543_v62  ;;  %v529_v9 = vld [vmem:[#allocation2] sm:$0xf] }
  0xac   : > { %v518_v18 = vadd.f32 %v1463_v41, %v470_v11  ;;  %v519_v30 = vadd.f32 %v1468_v42, %v471_v44  ;;  %v554_v21 = vadd.f32 %v553_v14, %v552_v4  ;;  %v563_v32 = vadd.f32 %v562_v28, %v561_v33 }
  0xad   : > { %v520_v20 = vadd.f32 %v1473_v46, %v472_v13  ;;  %v521_v35 = vadd.f32 %v1478_v47, %v473_v52  ;;  %v537_v59 = vrot.slane %v536_v39, 1  ;;  %v546_v36 = vrot.slane %v545_v16, 1 }
  0xae   : > { %v522_v2 = vadd.f32 %v1483_v50, %v474_v23  ;;  %v523_v37 = vadd.f32 %v1488_v51, %v475_v49  ;;  %v555_v0 = vrot.slane %v554_v21, 1  ;;  %v564_v40 = vrot.slane %v563_v32, 1 }
  0xaf   : > { %v525_v22 = vadd.f32 %v1498_v55, %v477_v17  ;;  %v526_v41 = vadd.f32 %v1503_v58, %v478_v26  ;;  %v538_v3 = vadd.f32 %v537_v59, %v536_v39  ;;  %v547_v42 = vadd.f32 %v546_v36, %v545_v16 }
  0xb0   : > { %v524_v61 = vadd.f32 %v1493_v54, %v476_v25  ;;  %v527_v46 = vadd.f32 %v1508_v60, %v479_v31  ;;  %v556_v63 = vadd.f32 %v555_v0, %v554_v21  ;;  %v565_v47 = vadd.f32 %v564_v40, %v563_v32 }
  0xb1   : > { %v580_v5 = vadd.f32 %v514_v38, %v513_v34  ;;  %v589_v24 = vadd.f32 %v518_v18, %v517_v29  ;;  %v571_v50 = vsel %vm570_vm6, %v547_v42, %v538_v3  ;;  %v528_v51 = vadd.f32 %v1515_v8, %v480_v6  ;;  %v579_v18 = vld [vmem:[#allocation3] sm:$0xf] }
  0xb2   : > { %v598_v43 = vadd.f32 %v522_v2, %v521_v35  ;;  %v607_v45 = vadd.f32 %v526_v41, %v525_v22  ;;  %v573_v55 = vsel %vm572_vm8, %v556_v63, %v571_v50  ;;  %vm630_vm10 = vcmask 1043456  }
  0xb3   : > { %v581_v58 = vadd.f32 %v580_v5, %v515_v12  ;;  %v590_v11 = vadd.f32 %v589_v24, %v519_v30  ;;  %v575_v44 = vsel %vm574_vm9, %v565_v47, %v573_v55  ;;  %v635_v36 = vlaneseq }
  0xb4   : > { %v599_v54 = vadd.f32 %v598_v43, %v523_v37  ;;  %v608_v1 = vadd.f32 %v607_v45, %v527_v46  ;;  %v577_v60 = vadd.f32 %v575_v44, %v529_v9  ;;  %vm642_vm11 = vcmask 24576  }
  0xb5   : > { %v582_v48 = vadd.f32 %v581_v58, %v516_v19  ;;  %v591_v13 = vadd.f32 %v590_v11, %v520_v20  ;;  %v636_v2 = vand.u32 127, %v635_v36  ;;  %v638_v37 = vshrl.u32 %v635_v36, 7 }
  0xb6   : > { %v600_v52 = vadd.f32 %v599_v54, %v524_v61  ;;  %v609_v7 = vadd.f32 %v608_v1, %v528_v51  ;;  %578 = vst [vmem:[#allocation2] sm:$0xf] %v577_v60 }
  0xb7   : > { %v583_v53 = vrot.slane %v582_v48, 4  ;;  %v592_v23 = vrot.slane %v591_v13, 4  ;;  %v639_v0 = vsub.s32 %v636_v2, %v638_v37 }
  0xb8   : > { %v601_v49 = vrot.slane %v600_v52, 4  ;;  %v610_v8 = vrot.slane %v609_v7, 4 }
  0xb9   : > { %v584_v15 = vadd.f32 %v583_v53, %v582_v48  ;;  %v593_v56 = vadd.f32 %v592_v23, %v591_v13 }
  0xba   : > { %v602_v25 = vadd.f32 %v601_v49, %v600_v52  ;;  %v611_v17 = vadd.f32 %v610_v8, %v609_v7 }
  0xbb   : > { %v585_v57 = vrot.slane %v584_v15, 2  ;;  %v594_v62 = vrot.slane %v593_v56, 2 }
  0xbc   : > { %v603_v26 = vrot.slane %v602_v25, 2  ;;  %v612_v31 = vrot.slane %v611_v17, 2 }
  0xbd   : > { %v586_v4 = vadd.f32 %v585_v57, %v584_v15  ;;  %v595_v33 = vadd.f32 %v594_v62, %v593_v56  ;;  %v629_v6 = vld [vmem:[#allocation2] sm:$0xf] }
  0xbe   : > { %v604_v34 = vadd.f32 %v603_v26, %v602_v25  ;;  %v613_v10 = vadd.f32 %v612_v31, %v611_v17  ;;  %v631_v27 = vsel %vm630_vm10, %v629_v6, 0.0 }
  0xbf   : > { %v587_v38 = vrot.slane %v586_v4, 1  ;;  %v596_v12 = vrot.slane %v595_v33, 1  ;;  %632 = vadd.xlane.f32.xlu0 %v631_v27 }
  0xc0   : > { %v605_v14 = vrot.slane %v604_v34, 1  ;;  %v614_v28 = vrot.slane %v613_v10, 1 }
  0xc1   : > { %v588_v19 = vadd.f32 %v587_v38, %v586_v4  ;;  %v597_v29 = vadd.f32 %v596_v12, %v595_v33 }
  0xc2   : > { %v606_v39 = vadd.f32 %v605_v14, %v604_v34  ;;  %v615_v16 = vadd.f32 %v614_v28, %v613_v10 }
  0xc3   : > { %v620_v30 = vsel %vm570_vm6, %v597_v29, %v588_v19 }
  0xc4   : > { %v621_v21 = vsel %vm572_vm8, %v606_v39, %v620_v30 }
  0xc5   : > { %v622_v32 = vsel %vm574_vm9, %v615_v16, %v621_v21 }
  0xc6   : > { %v624_v20 = vadd.f32 %v622_v32, %v579_v18 }
  0xc8   : > { %625 = vst [vmem:[#allocation3] sm:$0xf] %v624_v20 }
  0xcf   : > { %v644_v35 = vld [vmem:[#allocation3] sm:$0xf] }
  0xd0   : > { %v645_v59 = vsel %vm630_vm10, %v644_v35, 0.0 }
  0xd1   : > { %646 = vadd.xlane.f32.xlu0 %v645_v59 }
 0x14c   : > { %v633_v40 = vpop.xlane.xlu0 %632 }
 0x14d   : > { %v640_v22 = vrot.slane %v633_v40, %v639_v0 }
 0x14f   : > { %643 = vst.msk [vmem:[%s264_s4] sm:$0x1] %vm642_vm11, %v640_v22 }
 0x150   : > { %1044 = shalt.err (!%p1041_p9)
}
 0x151   : > { %s1045_s10 = scalar_lea.hbm %s1630_s19, 16  ;;  %s1049_s21 = scalar_lea.hbm %s1715_s2, 32 }
 0x152   : > { %p1046_p1 = scmp.ne.s32.totalorder %s1630_s19, %s1045_s10  ;;  %p1050_p5 = scmp.lt.u32.totalorder %s1630_s19, %s1715_s2 }
 0x153   : > { %p1051_p13 = scmp.lt.u32.totalorder %s1049_s21, %s1045_s10  ;;  %p1053_p0 = scmp.lt.u32.totalorder %s1045_s10, %s1630_s19 }
 0x154   : > { %p1047_p6 = pnand %p1046_p1, %p1738_p3 }
 0x155   : > { %p1052_p8 = por %p1051_p13, %p1050_p5 }
 0x156   : > { %p1048_p2 = pneg %p1047_p6 }
 0x157   : > { %p1054_p11 = por %p1053_p0, %p1052_p8 }
 0x159   : > { %p1055_p4 = pnand %p1054_p11, %p1048_p2 }
 0x15b   : > { %1058 = shalt.err (!%p1055_p4)
}
 0x15c   : > { %860 = dma.vmem_to_hbm [thread:$0]  (%p1738_p3), %s1632_s6, 16, %s1630_s19, %s656_s28  }
 0x15d   : > { %s270_s7 = scalar_lea.vmem [#allocation10], %s1326_s30  ;;  %s1663_s23 = scalar_lea.hbm %s1716_s3, %s851_s24 }
 0x15e   : > { %s687_s11 = sshll.u32 %s270_s7, 4  ;;  %v647_v41 = vpop.xlane.xlu0 %646  ;;  %s660_s8 = scalar_lea.sflag [#allocation11], %s1326_s30  ;;  %s1665_s11 = int_to_ptr.vmem [resolvable:$true] %s687_s11 }
 0x15f   : > { %v652_v3 = vrot.slane %v647_v41, %v639_v0  ;;  %s1059_s10 = scalar_lea.vmem %s1665_s11, 16  ;;  %s1157_s6 = smov [#allocation10]  }
 0x160   : > { %p1060_p7 = scmp.ne.s32.totalorder %s1665_s11, %s1059_s10  ;;  %s1063_s15 = sshll.u32 %s1157_s6, 4  ;;  %s1064_s15 = int_to_ptr.vmem [resolvable:$false] %s1063_s15 }
 0x161   : > { %654 = vst.msk [vmem:[%s270_s7] sm:$0x1] %vm642_vm11, %v652_v3  ;;  %s1065_s19 = scalar_lea.vmem %s1064_s15, 32  ;;  %p1066_p9 = scmp.lt.s32.totalorder %s1665_s11, %s1064_s15 }
 0x162   : > { %p1061_p10 = pnand %p1060_p7, %p1738_p3  ;;  %p1067_p1 = scmp.lt.s32.totalorder %s1065_s19, %s1059_s10 }
 0x164   : > { %p1062_p12 = pneg %p1061_p10  ;;  %p1068_p6 = por %p1067_p1, %p1066_p9 }
 0x166   : > { %p1069_p2 = pnand %p1068_p6, %p1062_p12 }
 0x168   : > { %1072 = shalt.err (!%p1069_p2)
}
 0x169   : > { %s1073_s30 = scalar_lea.hbm %s1663_s23, 16  ;;  %s1077_s5 = scalar_lea.hbm %s1716_s3, 32 }
 0x16a   : > { %p1074_p5 = scmp.ne.s32.totalorder %s1663_s23, %s1073_s30  ;;  %p1078_p0 = scmp.lt.u32.totalorder %s1663_s23, %s1716_s3 }
 0x16b   : > { %p1079_p11 = scmp.lt.u32.totalorder %s1077_s5, %s1073_s30  ;;  %p1081_p7 = scmp.lt.u32.totalorder %s1073_s30, %s1663_s23 }
 0x16c   : > { %p1075_p13 = pnand %p1074_p5, %p1738_p3 }
 0x16d   : > { %p1080_p4 = por %p1079_p11, %p1078_p0 }
 0x16e   : > { %p1076_p8 = pneg %p1075_p13 }
 0x16f   : > { %p1082_p10 = por %p1081_p7, %p1080_p4 }
 0x171   : > { %p1083_p12 = pnand %p1082_p10, %p1076_p8 }
 0x173   : > { %1086 = shalt.err (!%p1083_p12)
}
 0x174   : > { %861 = dma.vmem_to_hbm [thread:$0]  (%p1738_p3), %s1665_s11, 16, %s1663_s23, %s660_s8  }
 0x175 PF: > { %s699_s29 = sand.u32 1, %s1129_s12   ;;  %p1739_p9 = scmp.ne.s32.totalorder %s1725_s27, 0 }
 0x176   : > { %p1740_p1 = scmp.ge.s32.totalorder %s1149_s17, 2  ;;  %s700_s4 = scalar_lea.sflag [#allocation6], %s699_s29 }
 0x178   : > { %p872_p6 = pnand %p1740_p1, %p1739_p9 }
 0x17a   : > { %1120 = dma.done.wait (!%p872_p6), %s700_s4, 16  }
 0x17b   : > { %1122 = vsyncadd (!%p872_p6), %s700_s4, 4294967280  ;;  %s708_s7 = scalar_lea.sflag [#allocation11], %s699_s29 }
 0x17c   : > { %1124 = dma.done.wait (!%p872_p6), %s708_s7, 16  }
 0x17d   : > { %1126 = vsyncadd (!%p872_p6), %s708_s7, 4294967280  ;;  %s26_s17 = sadd.s32 1, %s1149_s17   ;;  %s1741_s12 = smov %s1133_s13 }
 0x17e   : > { %p23_p2 = scmp.ge.s32.totalorder %s26_s17, 4   ;;  %s1742_s13 = smov %s1137_s14 }
 0x17f   : > { %s1743_s14 = smov %s1234_s26  ;;  %s1744_s15 = smov %s1145_s16 }
 0x180   : > { %s1745_s16 = smov %s1747_s20  ;;  %25 = sbr.rel (!%p23_p2) target bundleno = 10 (0xa), region = 111 }
 0x187   :  { %712 = vsyncpa [#allocation5], 1 }
 0x188   :  { %714 = vsyncpa [#allocation5 + $0x1], 1 }
 0x189   :  { %715 = vsyncpa [#allocation8], 1 }
 0x18a   :  { %717 = vsyncpa [#allocation8 + $0x1], 1 }
 0x18b   :  { %718 = vsyncpa [#allocation6], 1 }
 0x18c   :  { %720 = vsyncpa [#allocation6 + $0x1], 1 }
 0x18d   :  { %721 = vsyncpa [#allocation11], 1 }
 0x18e   :  { %723 = vsyncpa [#allocation11 + $0x1], 1 }

</bundles_post_ra>
